<compile_context>
chip_gen: v5e
topology: v5e:2x2
jax: 0.10.0
libtpu: 0.0.40
codegen_flags: <defaults>
</compile_context>

<pallas_src>
import jax
import jax.numpy as jnp
import numpy as np
from jax.experimental import pallas as pl
from jax.experimental.pallas import tpu as pltpu

IMG = 48
D = IMG * IMG            # 2304 (multiple of 128 -> clean lane tiling)
LATENT = 128             # latent_features
OUT = 244                # output_features (PyTorch module)
OUT_PAD = 256            # padded to MXU/lane granule; pad entries are zeros
H1, H2 = 128, 256
EPS = 1e-5
TB = 8                   # batch tile (multiple of 8); <=16 on v7x, up to 32 on v5e/v6e
TK = 128                 # eigenvector-chunk tile (multiple of 128); nk = OUT_PAD // TK
EIG_DTYPE = jnp.bfloat16  # eigenface HBM-stream dtype (f32 accumulation on MXU)


# --------------------------------------------------------------------------
# Stage A: weights = MLP(feat_latent)   (full batch; BN uses batch statistics)
# --------------------------------------------------------------------------
def _bn_train(h, gamma, beta):
    mu = jnp.mean(h, axis=0, keepdims=True)
    var = jnp.mean((h - mu) ** 2, axis=0, keepdims=True)
    return gamma * (h - mu) * jax.lax.rsqrt(var + EPS) + beta


def mlp_kernel(feat_ref,
               w1_ref, b1_ref, g1_ref, be1_ref,
               w2_ref, b2_ref, g2_ref, be2_ref,
               w3_ref, b3_ref,
               out_ref):
    x = feat_ref[...]                                                    # (B, 128)
    h = jnp.dot(x, w1_ref[...], preferred_element_type=jnp.float32) + b1_ref[...]
    h = jnp.maximum(_bn_train(h, g1_ref[...], be1_ref[...]), 0.0)
    h = jnp.dot(h, w2_ref[...], preferred_element_type=jnp.float32) + b2_ref[...]
    h = jnp.maximum(_bn_train(h, g2_ref[...], be2_ref[...]), 0.0)
    # (B, OUT_PAD); columns OUT..OUT_PAD-1 are exactly zero (zero w3/b3 pad).
    out_ref[...] = jnp.dot(h, w3_ref[...], preferred_element_type=jnp.float32) + b3_ref[...]


# --------------------------------------------------------------------------
# Stage B: eigenface projection + reconstruction, tiled over (batch, eig-chunk)
# --------------------------------------------------------------------------
def eigen_kernel(images_ref, mean_ref, w_ref, eig_ref, out_ref, acc_ref):
    k = pl.program_id(1)

    @pl.when(k == 0)
    def _():
        acc_ref[...] = jnp.zeros_like(acc_ref)

    tb, tk, d = eig_ref.shape
    eig_dtype = eig_ref.dtype
    # Collapse leading dims (tb, tk, d) -> (tb*tk, d).  tk is a multiple of the
    # bf16 sublane packing so this is layout-preserving (no VMEM copy).
    eig_flat = eig_ref[...].reshape(tb * tk, d)                          # bf16
    centered = (images_ref[...] - mean_ref[...]).astype(eig_dtype)       # (tb, d)

    # Dense MXU matmul for the whole tile:
    #   s[b, b'*tk + kk] = <centered[b], eigenfaces[b', kk]>   (only b' == b used)
    s = jax.lax.dot_general(
        centered, eig_flat,
        dimension_numbers=(((1,), (1,)), ((), ())),
        preferred_element_type=jnp.float32)                              # (tb, tb*tk)

    # Keep only the block diagonal (b' == b) and fold in 0.7*w in one pass.
    row = jax.lax.broadcasted_iota(jnp.int32, (tb, tb * tk), 0)
    col = jax.lax.broadcasted_iota(jnp.int32, (tb, tb * tk), 1)
    mask = (col >= row * tk) & (col < (row + 1) * tk)
    w_tiled = jnp.concatenate([w_ref[...]] * tb, axis=1)                 # (tb, tb*tk)
    comb = jnp.where(mask, 0.7 * w_tiled + 0.3 * s, 0.0).astype(eig_dtype)

    # Second dense MXU matmul; zeroed off-diagonal blocks contribute exactly 0.
    acc_ref[...] += jax.lax.dot_general(
        comb, eig_flat,
        dimension_numbers=(((1,), (0,)), ((), ())),
        preferred_element_type=jnp.float32)                              # (tb, d)

    @pl.when(k == pl.num_programs(1) - 1)
    def _():
        # Single unmasked (tb, d) store per batch tile.
        out_ref[...] = mean_ref[...] + acc_ref[...]


# --------------------------------------------------------------------------
# One-time eigenface preprocessing (keep OUT of the per-call / jitted path)
# --------------------------------------------------------------------------
def preprocess_eigenfaces(eigenfaces, eig_dtype=EIG_DTYPE):
    """Pad OUT -> OUT_PAD with zero eigenvectors and cast to the streaming dtype.

    Call once at model-setup time so the pad + bf16 cast (a full f32 read +
    bf16 write of the biggest tensor) is not paid on every forward call.
    """
    pad_k = OUT_PAD - eigenfaces.shape[1]
    if pad_k:
        eigenfaces = jnp.pad(eigenfaces, ((0, 0), (0, pad_k), (0, 0)))
    return eigenfaces.astype(eig_dtype)


# --------------------------------------------------------------------------
# Wrapper
# --------------------------------------------------------------------------
def emotion_transform_net(images, feat_latent, mean_faces, eigenfaces, params,
                          tb=TB, tk=TK):
    B = images.shape[0]
    images_flat = images.reshape(B, D).astype(jnp.float32)
    mean_faces = mean_faces.astype(jnp.float32)

    # Accept either raw (B, OUT, D) f32 eigenfaces or pre-processed
    # (B, OUT_PAD, D) bf16 ones (preferred: call preprocess_eigenfaces once).
    if eigenfaces.shape[1] != OUT_PAD or eigenfaces.dtype != EIG_DTYPE:
        eigenfaces = preprocess_eigenfaces(eigenfaces)

    # ---- Stage A: MLP weights (full batch, one grid step; tiny) ----------
    w3p = jnp.pad(params['w3'], ((0, 0), (0, OUT_PAD - OUT)))
    b3p = jnp.pad(params['b3'], ((0, 0), (0, OUT_PAD - OUT)))
    mlp_inputs = (feat_latent.astype(jnp.float32),
                  params['w1'], params['b1'], params['g1'], params['be1'],
                  params['w2'], params['b2'], params['g2'], params['be2'],
                  w3p, b3p)

    def full_spec(a):
        nd = a.ndim
        return pl.BlockSpec(a.shape, lambda *_: (0,) * nd)

    weights = pl.pallas_call(
        mlp_kernel,
        out_shape=jax.ShapeDtypeStruct((B, OUT_PAD), jnp.float32),
        grid=(1,),
        in_specs=[full_spec(a) for a in mlp_inputs],
        out_specs=pl.BlockSpec((B, OUT_PAD), lambda *_: (0, 0)),
    )(*mlp_inputs)

    # ---- Stage B: eigenface stage ----------------------------------------
    nb = pl.cdiv(B, tb)
    nk = OUT_PAD // tk
    b_pad = nb * tb - B

    def padb(x):
        if b_pad == 0:
            return x
        return jnp.pad(x, ((0, b_pad),) + ((0, 0),) * (x.ndim - 1))

    imgs = padb(images_flat)
    means = padb(mean_faces)
    wts = padb(weights)
    eig = padb(eigenfaces)   # no-op in the steady state (B % tb == 0)

    pred = pl.pallas_call(
        eigen_kernel,
        out_shape=jax.ShapeDtypeStruct((nb * tb, D), jnp.float32),
        grid=(nb, nk),
        in_specs=[
            pl.BlockSpec((tb, D), lambda i, k: (i, 0)),            # images
            pl.BlockSpec((tb, D), lambda i, k: (i, 0)),            # mean_faces
            pl.BlockSpec((tb, tk), lambda i, k: (i, k)),           # MLP weights chunk
            pl.BlockSpec((tb, tk, D), lambda i, k: (i, k, 0)),     # eigenfaces chunk
        ],
        out_specs=pl.BlockSpec((tb, D), lambda i, k: (i, 0)),
        scratch_shapes=[pltpu.VMEM((tb, D), jnp.float32)],         # rec accumulator
        compiler_params=pltpu.CompilerParams(
            dimension_semantics=("parallel", "arbitrary"),   # batch shards across TCs
            vmem_limit_bytes=48 * 1024 * 1024,               # safe on v5e/v6e/v7x
        ),
    )(imgs, means, wts, eig)

    return pred[:B].reshape(B, 1, IMG, IMG)


# --------------------------------------------------------------------------
# Params / reference
# --------------------------------------------------------------------------
def init_params(key):
    # PyTorch nn.Linear default init: U(-1/sqrt(fan_in), 1/sqrt(fan_in)); BN gamma=1, beta=0.
    def linear(k, fan_in, fan_out):
        kw, kb = jax.random.split(k)
        bound = 1.0 / np.sqrt(fan_in)
        w = jax.random.uniform(kw, (fan_in, fan_out), jnp.float32, -bound, bound)
        b = jax.random.uniform(kb, (1, fan_out), jnp.float32, -bound, bound)
        return w, b

    k1, k2, k3 = jax.random.split(key, 3)
    w1, b1 = linear(k1, LATENT, H1)
    w2, b2 = linear(k2, H1, H2)
    w3, b3 = linear(k3, H2, OUT)
    return dict(
        w1=w1, b1=b1, g1=jnp.ones((1, H1), jnp.float32), be1=jnp.zeros((1, H1), jnp.float32),
        w2=w2, b2=b2, g2=jnp.ones((1, H2), jnp.float32), be2=jnp.zeros((1, H2), jnp.float32),
        w3=w3, b3=b3,
    )


def reference_forward(images, feat_latent, mean_faces, eigenfaces, p,
                      bf16_eig=False):
    # Pure-JAX reference of the PyTorch forward (training-mode BN).
    # bf16_eig=True mirrors the kernel's bf16 operand rounding so the tight
    # comparison isolates kernel correctness from the storage-dtype choice.
    B = images.shape[0]
    img = images.reshape(B, D)
    hp = jax.lax.Precision.HIGHEST

    def bn(h, g, b):
        mu = h.mean(0, keepdims=True)
        var = ((h - mu) ** 2).mean(0, keepdims=True)
        return g * (h - mu) / jnp.sqrt(var + EPS) + b

    h = jnp.maximum(bn(jnp.dot(feat_latent, p['w1'], precision=hp) + p['b1'],
                       p['g1'], p['be1']), 0.0)
    h = jnp.maximum(bn(jnp.dot(h, p['w2'], precision=hp) + p['b2'],
                       p['g2'], p['be2']), 0.0)
    w = jnp.dot(h, p['w3'], precision=hp) + p['b3']                       # (B, OUT)

    if bf16_eig:
        eig = eigenfaces.astype(jnp.bfloat16).astype(jnp.float32)
        centered = (img - mean_faces).astype(jnp.bfloat16).astype(jnp.float32)
    else:
        eig = eigenfaces
        centered = img - mean_faces

    p_img = jnp.einsum('bkd,bd->bk', eig, centered, precision=hp)
    comb = 0.7 * w + 0.3 * p_img
    if bf16_eig:
        comb = comb.astype(jnp.bfloat16).astype(jnp.float32)
    pred = mean_faces + jnp.einsum('bk,bkd->bd', comb, eig, precision=hp)
    return pred.reshape(B, 1, IMG, IMG)


if __name__ == "__main__":
    key = jax.random.PRNGKey(0)
    kimg, kfeat, kmean, keig, kp = jax.random.split(key, 5)

    B = 16  # 2 batch tiles x 2 eigvec chunks -> 4 grid steps (pipelined / megacore-friendly)
    images = jax.random.normal(kimg, (B, 1, IMG, IMG), jnp.float32)
    feat_latent = jax.random.normal(kfeat, (B, LATENT), jnp.float32)
    mean_faces = 0.1 * jax.random.normal(kmean, (B, D), jnp.float32)
    eigenfaces = 0.02 * jax.random.normal(keig, (B, OUT, D), jnp.float32)
    params = init_params(kp)

    # One-time preprocessing (pad OUT->OUT_PAD, cast to bf16), kept out of the
    # per-call path so the forward's eigenface HBM traffic really is bf16.
    eig_prepped = jax.block_until_ready(preprocess_eigenfaces(eigenfaces))

    pred = emotion_transform_net(images, feat_latent, mean_faces, eig_prepped, params)
    pred = jax.block_until_ready(pred)
    assert pred.shape == (B, 1, IMG, IMG)

    # Tight check against a reference with the same bf16 operand rounding.
    ref_q = reference_forward(images, feat_latent, mean_faces, eigenfaces, params,
                              bf16_eig=True)
    np.testing.assert_allclose(np.asarray(pred), np.asarray(ref_q), rtol=2e-3, atol=2e-3)

    # Looser check against pure-f32 PyTorch-equivalent semantics (difference is
    # only the bf16 eigenface/operand storage dtype).
    ref_f32 = reference_forward(images, feat_latent, mean_faces, eigenfaces, params,
                                bf16_eig=False)
    np.testing.assert_allclose(np.asarray(pred), np.asarray(ref_f32), rtol=3e-2, atol=3e-2)

    print("KERNEL_OK")
</pallas_src>

<mosaic_0001>
module attributes {stable_mosaic.version = 11 : i64} {
  func.func @mlp_kernel(%arg0: i32, %arg1: memref<16x128xf32, #tpu.memory_space<vmem>>, %arg2: memref<128x128xf32, #tpu.memory_space<vmem>>, %arg3: memref<1x128xf32, #tpu.memory_space<vmem>>, %arg4: memref<1x128xf32, #tpu.memory_space<vmem>>, %arg5: memref<1x128xf32, #tpu.memory_space<vmem>>, %arg6: memref<128x256xf32, #tpu.memory_space<vmem>>, %arg7: memref<1x256xf32, #tpu.memory_space<vmem>>, %arg8: memref<1x256xf32, #tpu.memory_space<vmem>>, %arg9: memref<1x256xf32, #tpu.memory_space<vmem>>, %arg10: memref<256x256xf32, #tpu.memory_space<vmem>>, %arg11: memref<1x256xf32, #tpu.memory_space<vmem>>, %arg12: memref<16x256xf32, #tpu.memory_space<vmem>>) attributes {dimension_semantics = [#tpu.dimension_semantics<arbitrary>], iteration_bounds = array<i64: 1>, scalar_prefetch = 0 : i64, scratch_operands = 0 : i64, tpu.core_type = #tpu.core_type<tc>, window_params = [{pipeline_mode = #tpu.pipeline_mode<synchronous>, transform_indices = @transform_0, window_bounds = array<i64: 16, 128>}, {pipeline_mode = #tpu.pipeline_mode<synchronous>, transform_indices = @transform_1, window_bounds = array<i64: 128, 128>}, {pipeline_mode = #tpu.pipeline_mode<synchronous>, transform_indices = @transform_2, window_bounds = array<i64: 1, 128>}, {pipeline_mode = #tpu.pipeline_mode<synchronous>, transform_indices = @transform_3, window_bounds = array<i64: 1, 128>}, {pipeline_mode = #tpu.pipeline_mode<synchronous>, transform_indices = @transform_4, window_bounds = array<i64: 1, 128>}, {pipeline_mode = #tpu.pipeline_mode<synchronous>, transform_indices = @transform_5, window_bounds = array<i64: 128, 256>}, {pipeline_mode = #tpu.pipeline_mode<synchronous>, transform_indices = @transform_6, window_bounds = array<i64: 1, 256>}, {pipeline_mode = #tpu.pipeline_mode<synchronous>, transform_indices = @transform_7, window_bounds = array<i64: 1, 256>}, {pipeline_mode = #tpu.pipeline_mode<synchronous>, transform_indices = @transform_8, window_bounds = array<i64: 1, 256>}, {pipeline_mode = #tpu.pipeline_mode<synchronous>, transform_indices = @transform_9, window_bounds = array<i64: 256, 256>}, {pipeline_mode = #tpu.pipeline_mode<synchronous>, transform_indices = @transform_10, window_bounds = array<i64: 1, 256>}, {pipeline_mode = #tpu.pipeline_mode<synchronous>, transform_indices = @transform_11, window_bounds = array<i64: 16, 256>}]} {
    %c0 = arith.constant 0 : index
    %c0_0 = arith.constant 0 : index
    %0 = vector.load %arg1[%c0, %c0_0] : memref<16x128xf32, #tpu.memory_space<vmem>>, vector<16x128xf32>
    %c0_1 = arith.constant 0 : index
    %c0_2 = arith.constant 0 : index
    %1 = vector.load %arg2[%c0_1, %c0_2] : memref<128x128xf32, #tpu.memory_space<vmem>>, vector<128x128xf32>
    %cst = arith.constant dense<0.000000e+00> : vector<16x128xf32>
    %2 = tpu.matmul %0, %1, %cst {dimension_numbers = #tpu.dot_dimension_numbers<[1], [0], [0], [1], [0, 0, 1, 1], [], []>} : vector<16x128xf32>, vector<128x128xf32>, vector<16x128xf32> -> vector<16x128xf32>
    %c0_3 = arith.constant 0 : index
    %c0_4 = arith.constant 0 : index
    %3 = vector.load %arg3[%c0_3, %c0_4] : memref<1x128xf32, #tpu.memory_space<vmem>>, vector<1x128xf32>
    %4 = vector.broadcast %3 : vector<1x128xf32> to vector<16x128xf32>
    %5 = arith.addf %2, %4 : vector<16x128xf32>
    %c0_5 = arith.constant 0 : index
    %c0_6 = arith.constant 0 : index
    %6 = vector.load %arg4[%c0_5, %c0_6] : memref<1x128xf32, #tpu.memory_space<vmem>>, vector<1x128xf32>
    %c0_7 = arith.constant 0 : index
    %c0_8 = arith.constant 0 : index
    %7 = vector.load %arg5[%c0_7, %c0_8] : memref<1x128xf32, #tpu.memory_space<vmem>>, vector<1x128xf32>
    %cst_9 = arith.constant dense<0.000000e+00> : vector<128xf32>
    %8 = vector.multi_reduction <add>, %5, %cst_9 [0] : vector<16x128xf32> to vector<128xf32>
    %9 = vector.shape_cast %8 : vector<128xf32> to vector<1x128xf32>
    %cst_10 = arith.constant 1.600000e+01 : f32
    %10 = vector.broadcast %cst_10 : f32 to vector<1x128xf32>
    %11 = arith.divf %9, %10 : vector<1x128xf32>
    %12 = vector.broadcast %11 : vector<1x128xf32> to vector<16x128xf32>
    %13 = arith.subf %5, %12 : vector<16x128xf32>
    %14 = arith.mulf %13, %13 : vector<16x128xf32>
    %cst_11 = arith.constant dense<0.000000e+00> : vector<128xf32>
    %15 = vector.multi_reduction <add>, %14, %cst_11 [0] : vector<16x128xf32> to vector<128xf32>
    %16 = vector.shape_cast %15 : vector<128xf32> to vector<1x128xf32>
    %cst_12 = arith.constant 1.600000e+01 : f32
    %17 = vector.broadcast %cst_12 : f32 to vector<1x128xf32>
    %18 = arith.divf %16, %17 : vector<1x128xf32>
    %19 = vector.broadcast %11 : vector<1x128xf32> to vector<16x128xf32>
    %20 = arith.subf %5, %19 : vector<16x128xf32>
    %21 = vector.broadcast %6 : vector<1x128xf32> to vector<16x128xf32>
    %22 = arith.mulf %21, %20 : vector<16x128xf32>
    %cst_13 = arith.constant 9.99999974E-6 : f32
    %23 = vector.broadcast %cst_13 : f32 to vector<1x128xf32>
    %24 = arith.addf %18, %23 : vector<1x128xf32>
    %25 = math.rsqrt %24 : vector<1x128xf32>
    %26 = vector.broadcast %25 : vector<1x128xf32> to vector<16x128xf32>
    %27 = arith.mulf %22, %26 : vector<16x128xf32>
    %28 = vector.broadcast %7 : vector<1x128xf32> to vector<16x128xf32>
    %29 = arith.addf %27, %28 : vector<16x128xf32>
    %cst_14 = arith.constant 0.000000e+00 : f32
    %30 = vector.broadcast %cst_14 : f32 to vector<16x128xf32>
    %31 = arith.maximumf %29, %30 : vector<16x128xf32>
    %c0_15 = arith.constant 0 : index
    %c0_16 = arith.constant 0 : index
    %32 = vector.load %arg6[%c0_15, %c0_16] : memref<128x256xf32, #tpu.memory_space<vmem>>, vector<128x256xf32>
    %cst_17 = arith.constant dense<0.000000e+00> : vector<16x256xf32>
    %33 = tpu.matmul %31, %32, %cst_17 {dimension_numbers = #tpu.dot_dimension_numbers<[1], [0], [0], [1], [0, 0, 1, 1], [], []>} : vector<16x128xf32>, vector<128x256xf32>, vector<16x256xf32> -> vector<16x256xf32>
    %c0_18 = arith.constant 0 : index
    %c0_19 = arith.constant 0 : index
    %34 = vector.load %arg7[%c0_18, %c0_19] : memref<1x256xf32, #tpu.memory_space<vmem>>, vector<1x256xf32>
    %35 = vector.broadcast %34 : vector<1x256xf32> to vector<16x256xf32>
    %36 = arith.addf %33, %35 : vector<16x256xf32>
    %c0_20 = arith.constant 0 : index
    %c0_21 = arith.constant 0 : index
    %37 = vector.load %arg8[%c0_20, %c0_21] : memref<1x256xf32, #tpu.memory_space<vmem>>, vector<1x256xf32>
    %c0_22 = arith.constant 0 : index
    %c0_23 = arith.constant 0 : index
    %38 = vector.load %arg9[%c0_22, %c0_23] : memref<1x256xf32, #tpu.memory_space<vmem>>, vector<1x256xf32>
    %cst_24 = arith.constant dense<0.000000e+00> : vector<256xf32>
    %39 = vector.multi_reduction <add>, %36, %cst_24 [0] : vector<16x256xf32> to vector<256xf32>
    %40 = vector.shape_cast %39 : vector<256xf32> to vector<1x256xf32>
    %cst_25 = arith.constant 1.600000e+01 : f32
    %41 = vector.broadcast %cst_25 : f32 to vector<1x256xf32>
    %42 = arith.divf %40, %41 : vector<1x256xf32>
    %43 = vector.broadcast %42 : vector<1x256xf32> to vector<16x256xf32>
    %44 = arith.subf %36, %43 : vector<16x256xf32>
    %45 = arith.mulf %44, %44 : vector<16x256xf32>
    %cst_26 = arith.constant dense<0.000000e+00> : vector<256xf32>
    %46 = vector.multi_reduction <add>, %45, %cst_26 [0] : vector<16x256xf32> to vector<256xf32>
    %47 = vector.shape_cast %46 : vector<256xf32> to vector<1x256xf32>
    %cst_27 = arith.constant 1.600000e+01 : f32
    %48 = vector.broadcast %cst_27 : f32 to vector<1x256xf32>
    %49 = arith.divf %47, %48 : vector<1x256xf32>
    %50 = vector.broadcast %42 : vector<1x256xf32> to vector<16x256xf32>
    %51 = arith.subf %36, %50 : vector<16x256xf32>
    %52 = vector.broadcast %37 : vector<1x256xf32> to vector<16x256xf32>
    %53 = arith.mulf %52, %51 : vector<16x256xf32>
    %cst_28 = arith.constant 9.99999974E-6 : f32
    %54 = vector.broadcast %cst_28 : f32 to vector<1x256xf32>
    %55 = arith.addf %49, %54 : vector<1x256xf32>
    %56 = math.rsqrt %55 : vector<1x256xf32>
    %57 = vector.broadcast %56 : vector<1x256xf32> to vector<16x256xf32>
    %58 = arith.mulf %53, %57 : vector<16x256xf32>
    %59 = vector.broadcast %38 : vector<1x256xf32> to vector<16x256xf32>
    %60 = arith.addf %58, %59 : vector<16x256xf32>
    %cst_29 = arith.constant 0.000000e+00 : f32
    %61 = vector.broadcast %cst_29 : f32 to vector<16x256xf32>
    %62 = arith.maximumf %60, %61 : vector<16x256xf32>
    %c0_30 = arith.constant 0 : index
    %c0_31 = arith.constant 0 : index
    %63 = vector.load %arg10[%c0_30, %c0_31] : memref<256x256xf32, #tpu.memory_space<vmem>>, vector<256x256xf32>
    %cst_32 = arith.constant dense<0.000000e+00> : vector<16x256xf32>
    %64 = tpu.matmul %62, %63, %cst_32 {dimension_numbers = #tpu.dot_dimension_numbers<[1], [0], [0], [1], [0, 0, 1, 1], [], []>} : vector<16x256xf32>, vector<256x256xf32>, vector<16x256xf32> -> vector<16x256xf32>
    %c0_33 = arith.constant 0 : index
    %c0_34 = arith.constant 0 : index
    %65 = vector.load %arg11[%c0_33, %c0_34] : memref<1x256xf32, #tpu.memory_space<vmem>>, vector<1x256xf32>
    %66 = vector.broadcast %65 : vector<1x256xf32> to vector<16x256xf32>
    %67 = arith.addf %64, %66 : vector<16x256xf32>
    %c0_35 = arith.constant 0 : index
    %c0_36 = arith.constant 0 : index
    %68 = vector.load %arg12[%c0_35, %c0_36] : memref<16x256xf32, #tpu.memory_space<vmem>>, vector<16x256xf32>
    tpu.vector_store %arg12[%c0_35, %c0_36], %67 {strides = array<i32>} : memref<16x256xf32, #tpu.memory_space<vmem>>, vector<16x256xf32>,
    return
  }
  func.func @transform_0(%arg0: i32) -> (i32, i32) {
    %c0_i32 = arith.constant 0 : i32
    %c0_i32_0 = arith.constant 0 : i32
    %c0_i32_1 = arith.constant 0 : i32
    return %c0_i32, %c0_i32_0 : i32, i32
  }
  func.func @transform_1(%arg0: i32) -> (i32, i32) {
    %c0_i32 = arith.constant 0 : i32
    %c0_i32_0 = arith.constant 0 : i32
    %c0_i32_1 = arith.constant 0 : i32
    return %c0_i32, %c0_i32_0 : i32, i32
  }
  func.func @transform_2(%arg0: i32) -> (i32, i32) {
    %c0_i32 = arith.constant 0 : i32
    %c0_i32_0 = arith.constant 0 : i32
    %c0_i32_1 = arith.constant 0 : i32
    return %c0_i32, %c0_i32_0 : i32, i32
  }
  func.func @transform_3(%arg0: i32) -> (i32, i32) {
    %c0_i32 = arith.constant 0 : i32
    %c0_i32_0 = arith.constant 0 : i32
    %c0_i32_1 = arith.constant 0 : i32
    return %c0_i32, %c0_i32_0 : i32, i32
  }
  func.func @transform_4(%arg0: i32) -> (i32, i32) {
    %c0_i32 = arith.constant 0 : i32
    %c0_i32_0 = arith.constant 0 : i32
    %c0_i32_1 = arith.constant 0 : i32
    return %c0_i32, %c0_i32_0 : i32, i32
  }
  func.func @transform_5(%arg0: i32) -> (i32, i32) {
    %c0_i32 = arith.constant 0 : i32
    %c0_i32_0 = arith.constant 0 : i32
    %c0_i32_1 = arith.constant 0 : i32
    return %c0_i32, %c0_i32_0 : i32, i32
  }
  func.func @transform_6(%arg0: i32) -> (i32, i32) {
    %c0_i32 = arith.constant 0 : i32
    %c0_i32_0 = arith.constant 0 : i32
    %c0_i32_1 = arith.constant 0 : i32
    return %c0_i32, %c0_i32_0 : i32, i32
  }
  func.func @transform_7(%arg0: i32) -> (i32, i32) {
    %c0_i32 = arith.constant 0 : i32
    %c0_i32_0 = arith.constant 0 : i32
    %c0_i32_1 = arith.constant 0 : i32
    return %c0_i32, %c0_i32_0 : i32, i32
  }
  func.func @transform_8(%arg0: i32) -> (i32, i32) {
    %c0_i32 = arith.constant 0 : i32
    %c0_i32_0 = arith.constant 0 : i32
    %c0_i32_1 = arith.constant 0 : i32
    return %c0_i32, %c0_i32_0 : i32, i32
  }
  func.func @transform_9(%arg0: i32) -> (i32, i32) {
    %c0_i32 = arith.constant 0 : i32
    %c0_i32_0 = arith.constant 0 : i32
    %c0_i32_1 = arith.constant 0 : i32
    return %c0_i32, %c0_i32_0 : i32, i32
  }
  func.func @transform_10(%arg0: i32) -> (i32, i32) {
    %c0_i32 = arith.constant 0 : i32
    %c0_i32_0 = arith.constant 0 : i32
    %c0_i32_1 = arith.constant 0 : i32
    return %c0_i32, %c0_i32_0 : i32, i32
  }
  func.func @transform_11(%arg0: i32) -> (i32, i32) {
    %c0_i32 = arith.constant 0 : i32
    %c0_i32_0 = arith.constant 0 : i32
    %c0_i32_1 = arith.constant 0 : i32
    return %c0_i32, %c0_i32_0 : i32, i32
  }
}

</mosaic_0001>

<bundles_post_ra>
// kernel: tpu_custom_call.1
= control target key start
LH: loop header
LB: loop body
LE: loop exit
PB: predicated region body
PF: predicated region fallthrough
CT: control target
= control target key end

     0   :  { %16 = vsyncpa [#allocation3], 0  ;;  %s1007_s0 = inlined_call_operand.hbm [shape: f32[16,128], index: 0, kind: input, shape index: {}]   ;;  %s1008_s1 = inlined_call_operand.hbm [shape: f32[128,128], index: 1, kind: input, shape index: {}]   ;;  %s1009_s2 = inlined_call_operand.hbm [shape: f32[1,128], index: 2, kind: input, shape index: {}]   ;;  %s1010_s3 = inlined_call_operand.hbm [shape: f32[1,128], index: 3, kind: input, shape index: {}]   ;;  %s1011_s4 = inlined_call_operand.hbm [shape: f32[1,128], index: 4, kind: input, shape index: {}]   ;;  %s1012_s5 = inlined_call_operand.hbm [shape: f32[128,256], index: 5, kind: input, shape index: {}]   ;;  %s1013_s6 = inlined_call_operand.vmem [shape: f32[1,256], index: 6, kind: input, shape index: {}]   ;;  %s1014_s7 = inlined_call_operand.vmem [shape: f32[1,256], index: 7, kind: input, shape index: {}]   ;;  %s1015_s8 = inlined_call_operand.vmem [shape: f32[1,256], index: 8, kind: input, shape index: {}]   ;;  %s1016_s9 = inlined_call_operand.hbm [shape: f32[256,256], index: 9, kind: input, shape index: {}]   ;;  %s1017_s10 = inlined_call_operand.vmem [shape: f32[1,256], index: 10, kind: input, shape index: {}]   ;;  %s1018_s11 = inlined_call_operand.hbm [shape: f32[16,256], index: 11, kind: output, shape index: {}]  }
   0x1   :  { %17 = vsyncpa [#allocation6], 0 }
   0x2   :  { %18 = vsyncpa [#allocation9], 0 }
   0x3   :  { %19 = vsyncpa [#allocation12], 0 }
   0x4   :  { %20 = vsyncpa [#allocation4], 0  ;;  %s38_s19 = sshll.u32 %s1008_s1, 4  ;;  %s845_s20 = smov [#allocation5]   ;;  %s39_s19 = int_to_ptr.hbm [resolvable:$true] %s38_s19 }
   0x5   :  { %s40_s21 = sshll.u32 %s845_s20, 4  ;;  %s63_s24 = sshll.u32 %s1010_s3, 4  ;;  %s41_s21 = int_to_ptr.vmem [resolvable:$true] %s40_s21  ;;  %s64_s24 = int_to_ptr.hbm [resolvable:$true] %s63_s24 }
   0x6   :  { %s846_s25 = smov 128   ;;  %s847_s26 = smov 8  }
   0x7   :  { %46 = dma.hbm_to_vmem [thread:$0]  %s39_s19, 2048, %s41_s21, [#allocation6], %s846_s25, %s846_s25, %s847_s26  }
   0x8   :  { %s848_s27 = smov [#allocation8]   ;;  %s84_s12 = sshll.u32 %s1012_s5, 4  ;;  %s85_s12 = int_to_ptr.hbm [resolvable:$true] %s84_s12 }
   0x9   :  { %s65_s28 = sshll.u32 %s848_s27, 4  ;;  %s849_s1 = smov [#allocation11]   ;;  %s66_s28 = int_to_ptr.vmem [resolvable:$true] %s65_s28 }
   0xa   :  { %68 = dma.hbm_to_vmem [thread:$0]  %s64_s24, 16, %s66_s28, [#allocation9]  }
   0xb   :  { %s86_s13 = sshll.u32 %s849_s1, 4  ;;  %s25_s3 = sshll.u32 %s1007_s0, 4  ;;  %s87_s13 = int_to_ptr.vmem [resolvable:$true] %s86_s13  ;;  %s26_s3 = int_to_ptr.hbm [resolvable:$true] %s25_s3 }
   0xc   :  { %s850_s16 = smov 256   ;;  %s851_s17 = smov 16  }
   0xd   :  { %92 = dma.hbm_to_vmem [thread:$0]  %s85_s12, 4096, %s87_s13, [#allocation12], %s850_s16, %s850_s16, %s851_s17  }
   0xe   :  { %s852_s18 = smov [#allocation2]   ;;  %s52_s21 = sshll.u32 %s1009_s2, 4  ;;  %s53_s21 = int_to_ptr.hbm [resolvable:$true] %s52_s21 }
   0xf   :  { %s27_s19 = sshll.u32 %s852_s18, 4  ;;  %s74_s0 = sshll.u32 %s1011_s4, 4  ;;  %s28_s19 = int_to_ptr.vmem [resolvable:$true] %s27_s19  ;;  %s75_s0 = int_to_ptr.hbm [resolvable:$true] %s74_s0 }
  0x10   :  { %33 = dma.hbm_to_vmem [thread:$0]  %s26_s3, 256, %s28_s19, [#allocation3], %s846_s25, %s846_s25, %s847_s26  }
  0x11   :  { %s853_s24 = smov [#allocation7]   ;;  %s854_s28 = smov [#allocation10]  }
  0x12   :  { %s54_s27 = sshll.u32 %s853_s24, 4  ;;  %s76_s29 = sshll.u32 %s854_s28, 4  ;;  %s55_s27 = int_to_ptr.vmem [resolvable:$true] %s54_s27  ;;  %s77_s29 = int_to_ptr.vmem [resolvable:$true] %s76_s29 }
  0x13   :  { %57 = dma.hbm_to_vmem [thread:$0]  %s53_s21, 16, %s55_s27, [#allocation6]  }
  0x14   :  { %s103_s1 = sshll.u32 %s1016_s9, 4  ;;  %s855_s2 = smov [#allocation13]   ;;  %s104_s1 = int_to_ptr.hbm [resolvable:$true] %s103_s1 }
  0x15   :  { %79 = dma.hbm_to_vmem [thread:$0]  %s75_s0, 16, %s77_s29, [#allocation9]  }
  0x16   :  { %s105_s25 = sshll.u32 %s855_s2, 4  ;;  %s106_s25 = int_to_ptr.vmem [resolvable:$true] %s105_s25 }
  0x17   :  { %111 = dma.hbm_to_vmem [thread:$0]  %s104_s1, 8192, %s106_s25, [#allocation12], %s850_s16, %s850_s16, %s851_s17  }
  0x18   :  { %835 = dma.done.wait [#allocation3], 256  }
  0x19   :  { %836 = vsyncadd [#allocation3], 4294967040 }
  0x1a   :  { %837 = dma.done.wait [#allocation6], 2064  }
  0x1b   :  { %838 = vsyncadd [#allocation6], 4294965232 }
  0x1c   :  { %839 = dma.done.wait [#allocation9], 32  }
  0x1d   :  { %840 = vsyncadd [#allocation9], 4294967264 }
  0x1e   :  { %841 = dma.done.wait [#allocation12], 12288  }
  0x1f   :  { %842 = vsyncadd [#allocation12], 4294955008  ;;  %v159_v0 = vld [vmem:[#allocation5 + $0x78] sm:$0xff]  ;;  %v158_v1 = vld [vmem:[#allocation5 + $0x70] sm:$0xff]  ;;  %v856_v18 = vmov 16.0   ;;  %s857_s15 = smov [#allocation14]  }
  0x20   :  { %164 = vmatpush.msra.mxu0 %v159_v0  ;;  %v157_v2 = vld [vmem:[#allocation5 + $0x68] sm:$0xff]  ;;  %v156_v3 = vld [vmem:[#allocation5 + $0x60] sm:$0xff]  ;;  %v155_v4 = vld [vmem:[#allocation5 + $0x58] sm:$0xff]  ;;  %635 = vrcp.f32 %v856_v18  ;;  %s585_s3 = sshll.u32 %s857_s15, 4  ;;  %s587_s19 = sshll.u32 %s1018_s11, 4  ;;  %s586_s3 = int_to_ptr.vmem [resolvable:$true] %s585_s3  ;;  %s588_s19 = int_to_ptr.hbm [resolvable:$true] %s587_s19 }
  0x21   :  { %v154_v5 = vld [vmem:[#allocation5 + $0x50] sm:$0xff]  ;;  %v153_v6 = vld [vmem:[#allocation5 + $0x48] sm:$0xff]  ;;  %v152_v7 = vld [vmem:[#allocation5 + $0x40] sm:$0xff] }
  0x22   :  { %165 = vmatpush.msra.mxu0 %v158_v1  ;;  %v151_v8 = vld [vmem:[#allocation5 + $0x38] sm:$0xff]  ;;  %v150_v9 = vld [vmem:[#allocation5 + $0x30] sm:$0xff]  ;;  %v149_v10 = vld [vmem:[#allocation5 + $0x28] sm:$0xff] }
  0x23   :  { %v148_v11 = vld [vmem:[#allocation5 + $0x20] sm:$0xff]  ;;  %v147_v12 = vld [vmem:[#allocation5 + $0x18] sm:$0xff]  ;;  %v146_v13 = vld [vmem:[#allocation5 + $0x10] sm:$0xff] }
  0x24   :  { %166 = vmatpush.msra.mxu0 %v157_v2  ;;  %v145_v14 = vld [vmem:[#allocation5 + $0x8] sm:$0xff]  ;;  %v144_v15 = vld [vmem:[#allocation5] sm:$0xff]  ;;  %v142_v16 = vld [vmem:[#allocation2] sm:$0xff] }
  0x25   :  { %v143_v17 = vld [vmem:[#allocation2 + $0x8] sm:$0xff]  ;;  %v632_v21 = vld [vmem:[#allocation7] ss:$0 sm:$0xff]  ;;  %v269_v30 = vld [vmem:[#allocation11 + $0xe0] sm:$0xff] }
  0x26   :  { %167 = vmatpush.msra.mxu0 %v156_v3  ;;  %v636_v20 = vpop.eup %635  ;;  %v271_v26 = vld [vmem:[#allocation11 + $0xf0] sm:$0xff]  ;;  %v272_v27 = vld [vmem:[#allocation11 + $0xf8] sm:$0xff]  ;;  %v270_v31 = vld [vmem:[#allocation11 + $0xe8] sm:$0xff] }
  0x27   :  { %v197_v22 = vmul.f32 16.0, %v636_v20  ;;  %279 = vmatpush.msra.mxu1 %v271_v26  ;;  %302 = vmatpush.msra.mxu2 %v272_v27  ;;  %v267_v32 = vld [vmem:[#allocation11 + $0xd0] sm:$0xff]  ;;  %v268_v33 = vld [vmem:[#allocation11 + $0xd8] sm:$0xff]  ;;  %v265_v35 = vld [vmem:[#allocation11 + $0xc0] sm:$0xff]  ;;  %vm201_vm0 = vweird.f32 %v636_v20 }
  0x28   :  { %168 = vmatpush.msra.mxu0 %v155_v4  ;;  %v266_v36 = vld [vmem:[#allocation11 + $0xc8] sm:$0xff]  ;;  %v263_v39 = vld [vmem:[#allocation11 + $0xb0] sm:$0xff]  ;;  %v264_v40 = vld [vmem:[#allocation11 + $0xb8] sm:$0xff] }
  0x29   :  { %v198_v28 = vsub.f32 1.0, %v197_v22  ;;  %280 = vmatpush.msra.mxu1 %v269_v30  ;;  %303 = vmatpush.msra.mxu2 %v270_v31  ;;  %v261_v42 = vld [vmem:[#allocation11 + $0xa0] sm:$0xff]  ;;  %v262_v43 = vld [vmem:[#allocation11 + $0xa8] sm:$0xff]  ;;  %v259_v46 = vld [vmem:[#allocation11 + $0x90] sm:$0xff] }
  0x2a   :  { %169 = vmatpush.msra.mxu0 %v154_v5  ;;  %v260_v47 = vld [vmem:[#allocation11 + $0x98] sm:$0xff]  ;;  %v257_v49 = vld [vmem:[#allocation11 + $0x80] sm:$0xff]  ;;  %v258_v50 = vld [vmem:[#allocation11 + $0x88] sm:$0xff] }
  0x2b   :  { %v199_v37 = vmul.f32 %v636_v20, %v198_v28  ;;  %281 = vmatpush.msra.mxu1 %v267_v32  ;;  %304 = vmatpush.msra.mxu2 %v268_v33  ;;  %v255_v53 = vld [vmem:[#allocation11 + $0x70] sm:$0xff]  ;;  %v256_v54 = vld [vmem:[#allocation11 + $0x78] sm:$0xff]  ;;  %v253_v56 = vld [vmem:[#allocation11 + $0x60] sm:$0xff] }
  0x2c   :  { %170 = vmatpush.msra.mxu0 %v153_v6  ;;  %v254_v57 = vld [vmem:[#allocation11 + $0x68] sm:$0xff]  ;;  %v251_v60 = vld [vmem:[#allocation11 + $0x50] sm:$0xff]  ;;  %v252_v61 = vld [vmem:[#allocation11 + $0x58] sm:$0xff] }
  0x2d   :  { %282 = vmatpush.msra.mxu1 %v265_v35  ;;  %305 = vmatpush.msra.mxu2 %v266_v36  ;;  %v200_v44 = vadd.f32 %v636_v20, %v199_v37  ;;  %v249_v0 = vld [vmem:[#allocation11 + $0x40] sm:$0xff]  ;;  %v250_v1 = vld [vmem:[#allocation11 + $0x48] sm:$0xff]  ;;  %v247_v3 = vld [vmem:[#allocation11 + $0x30] sm:$0xff] }
  0x2e   :  { %171 = vmatpush.msra.mxu0 %v152_v7  ;;  %v248_v4 = vld [vmem:[#allocation11 + $0x38] sm:$0xff]  ;;  %v245_v6 = vld [vmem:[#allocation11 + $0x20] sm:$0xff]  ;;  %v246_v7 = vld [vmem:[#allocation11 + $0x28] sm:$0xff] }
  0x2f   :  { %283 = vmatpush.msra.mxu1 %v263_v39  ;;  %306 = vmatpush.msra.mxu2 %v264_v40  ;;  %v945_v51 = vsel %vm201_vm0, %v636_v20, %v200_v44  ;;  %v634_v27 = vld [vmem:[#allocation10] ss:$0 sm:$0xff]  ;;  %v445_v36 = vld [vmem:[#allocation13 + $0xf0] sm:$0xff]  ;;  %v443_v37 = vld [vmem:[#allocation13 + $0xe0] sm:$0xff] }
  0x30   :  { %172 = vmatpush.msra.mxu0 %v151_v8  ;;  %485 = vmatpush.msra.mxu3 %v445_v36  ;;  %v439_v40 = vld [vmem:[#allocation13 + $0xc0] sm:$0xff] }
  0x31   :  { %284 = vmatpush.msra.mxu1 %v261_v42  ;;  %307 = vmatpush.msra.mxu2 %v262_v43  ;;  %v437_v42 = vld [vmem:[#allocation13 + $0xb0] sm:$0xff]  ;;  %v435_v43 = vld [vmem:[#allocation13 + $0xa0] sm:$0xff] }
  0x32   :  { %173 = vmatpush.msra.mxu0 %v150_v9  ;;  %v243_v9 = vld [vmem:[#allocation11 + $0x10] sm:$0xff]  ;;  %486 = vmatpush.msra.mxu3 %v443_v37 }
  0x33   :  { %285 = vmatpush.msra.mxu1 %v259_v46  ;;  %308 = vmatpush.msra.mxu2 %v260_v47  ;;  %v433_v46 = vld [vmem:[#allocation13 + $0x90] sm:$0xff] }
  0x34   :  { %174 = vmatpush.msra.mxu0 %v149_v10  ;;  %v244_v10 = vld [vmem:[#allocation11 + $0x18] sm:$0xff] }
  0x35   :  { %286 = vmatpush.msra.mxu1 %v257_v49  ;;  %309 = vmatpush.msra.mxu2 %v258_v50 }
  0x36   :  { %175 = vmatpush.msra.mxu0 %v148_v11 }
  0x37   :  { %287 = vmatpush.msra.mxu1 %v255_v53  ;;  %310 = vmatpush.msra.mxu2 %v256_v54  ;;  %v429_v53 = vld [vmem:[#allocation13 + $0x70] sm:$0xff] }
  0x38   :  { %176 = vmatpush.msra.mxu0 %v147_v12  ;;  %v241_v12 = vld [vmem:[#allocation11] sm:$0xff] }
  0x39   :  { %288 = vmatpush.msra.mxu1 %v253_v56  ;;  %311 = vmatpush.msra.mxu2 %v254_v57  ;;  %v444_v56 = vld [vmem:[#allocation13 + $0xe8] sm:$0xff]  ;;  %v427_v57 = vld [vmem:[#allocation13 + $0x60] sm:$0xff] }
  0x3a   :  { %177 = vmatpush.msra.mxu0 %v146_v13  ;;  %v242_v13 = vld [vmem:[#allocation11 + $0x8] sm:$0xff] }
  0x3b   :  { %289 = vmatpush.msra.mxu1 %v251_v60  ;;  %312 = vmatpush.msra.mxu2 %v252_v61  ;;  %v425_v61 = vld [vmem:[#allocation13 + $0x50] sm:$0xff] }
  0x3c   :  { %178 = vmatpush.msra.mxu0 %v145_v14 }
  0x3d   :  { %290 = vmatpush.msra.mxu1 %v249_v0  ;;  %313 = vmatpush.msra.mxu2 %v250_v1  ;;  %v477_v1 = vld [vmem:[#allocation13 + $0x1f0] sm:$0xff] }
  0x3e   :  { %179 = vmatpush.msra.mxu0 %v144_v15 }
  0x3f   :  { %180 = vmatmul.f32.vlgmr.msra.gmra.mxu0 %v142_v16  ;;  %291 = vmatpush.msra.mxu1 %v247_v3  ;;  %v478_v3 = vld [vmem:[#allocation13 + $0x1f8] sm:$0xff] }
  0x40   :  { %314 = vmatpush.msra.mxu2 %v248_v4  ;;  %508 = vmatpush.msrb.mxu0 %v477_v1  ;;  %v423_v4 = vld [vmem:[#allocation13 + $0x40] sm:$0xff] }
  0x41   :  { %292 = vmatpush.msra.mxu1 %v245_v6 }
  0x42   :  { %315 = vmatpush.msra.mxu2 %v246_v7  ;;  %v475_v7 = vld [vmem:[#allocation13 + $0x1e0] sm:$0xff] }
  0x43   :  { %293 = vmatpush.msra.mxu1 %v243_v9  ;;  %v476_v9 = vld [vmem:[#allocation13 + $0x1e8] sm:$0xff]  ;;  %509 = vmatpush.msrb.mxu0 %v475_v7 }
  0x44   :  { %316 = vmatpush.msra.mxu2 %v244_v10  ;;  %v421_v10 = vld [vmem:[#allocation13 + $0x30] sm:$0xff] }
  0x45   :  { %294 = vmatpush.msra.mxu1 %v241_v12 }
  0x46   :  { %317 = vmatpush.msra.mxu2 %v242_v13  ;;  %v473_v13 = vld [vmem:[#allocation13 + $0x1d0] sm:$0xff] }
  0x47   :  { %183 = vmatmul.f32.gmra.mxu0 %v143_v17 }
  0x48   :  { %554 = vmatpush.msrb.mxu2 %v478_v3  ;;  %510 = vmatpush.msrb.mxu0 %v473_v13  ;;  %v418_v3 = vld [vmem:[#allocation13 + $0x18] sm:$0xff] }
  0x4a   :  { %555 = vmatpush.msrb.mxu2 %v476_v9  ;;  %v454_v9 = vld [vmem:[#allocation13 + $0x138] sm:$0xff] }
  0xbc   :  { %v181_v19 = vpop.f32.mrf.mxu0 }
  0xbd   :  { %v182_v24 = vadd.f32 %v632_v21, %v181_v19 }
  0xc4   :  { %v184_v23 = vpop.f32.mrf.mxu0 }
  0xc5   :  { %v185_v25 = vadd.f32 %v632_v21, %v184_v23  ;;  %v633_v23 = vld [vmem:[#allocation8] ss:$0 sm:$0xff] }
  0xc7   :  { %v189_v29 = vadd.f32 %v185_v25, %v182_v24 }
  0xc9   :  { %v190_v34 = vrot.slane %v189_v29, 4 }
  0xcb   :  { %v191_v38 = vadd.f32 %v190_v34, %v189_v29 }
  0xcd   :  { %v192_v41 = vrot.slane %v191_v38, 2 }
  0xcf   :  { %v193_v45 = vadd.f32 %v192_v41, %v191_v38  ;;  %v441_v38 = vld [vmem:[#allocation13 + $0xd0] sm:$0xff]  ;;  %v273_v41 = vld [vmem:[%s1013_s6] sm:$0x3] }
  0xd0   :  { %487 = vmatpush.msra.mxu3 %v441_v38  ;;  %v275_v44 = vperm.slane %v273_v41, 0  ;;  %v276_v54 = vperm.slane %v273_v41, 1  ;;  %v426_v41 = vld [vmem:[#allocation13 + $0x58] sm:$0xff] }
  0xd1   :  { %v194_v48 = vrot.slane %v193_v45, 1 }
  0xd2   :  { %488 = vmatpush.msra.mxu3 %v439_v40  ;;  %v463_v40 = vld [vmem:[#allocation13 + $0x180] sm:$0xff] }
  0xd3   :  { %v195_v52 = vadd.f32 %v194_v48, %v193_v45  ;;  %v431_v48 = vld [vmem:[#allocation13 + $0x80] sm:$0xff] }
  0xd4   :  { %489 = vmatpush.msra.mxu3 %v437_v42 }
  0xd5   :  { %v203_v55 = vmul.f32 %v945_v51, %v195_v52  ;;  %v446_v52 = vld [vmem:[#allocation13 + $0xf8] sm:$0xff] }
  0xd6   :  { %490 = vmatpush.msra.mxu3 %v435_v43  ;;  %531 = vmatpush.msrb.mxu1 %v446_v52  ;;  %v459_v52 = vld [vmem:[#allocation13 + $0x160] sm:$0xff] }
  0xd7   :  { %v204_v58 = vsub.f32 %v182_v24, %v203_v55  ;;  %v205_v59 = vsub.f32 %v185_v25, %v203_v55 }
  0xd8   :  { %491 = vmatpush.msra.mxu3 %v433_v46  ;;  %532 = vmatpush.msrb.mxu1 %v444_v56  ;;  %v461_v46 = vld [vmem:[#allocation13 + $0x170] sm:$0xff]  ;;  %v422_v56 = vld [vmem:[#allocation13 + $0x38] sm:$0xff] }
  0xd9   :  { %v206_v62 = vmul.f32 %v204_v58, %v204_v58  ;;  %v207_v63 = vmul.f32 %v205_v59, %v205_v59  ;;  %v219_v26 = vmul.f32 %v633_v23, %v204_v58  ;;  %v220_v30 = vmul.f32 %v633_v23, %v205_v59  ;;  %v442_v59 = vld [vmem:[#allocation13 + $0xd8] sm:$0xff] }
  0xda   :  { %492 = vmatpush.msra.mxu3 %v431_v48  ;;  %533 = vmatpush.msrb.mxu1 %v442_v59 }
  0xdb   :  { %v208_v2 = vadd.f32 %v207_v63, %v206_v62 }
  0xdc   :  { %493 = vmatpush.msra.mxu3 %v429_v53 }
  0xdd   :  { %v209_v5 = vrot.slane %v208_v2, 4 }
  0xde   :  { %494 = vmatpush.msra.mxu3 %v427_v57  ;;  %v460_v57 = vld [vmem:[#allocation13 + $0x168] sm:$0xff] }
  0xdf   :  { %v210_v8 = vadd.f32 %v209_v5, %v208_v2  ;;  %v440_v2 = vld [vmem:[#allocation13 + $0xc8] sm:$0xff] }
  0xe0   :  { %495 = vmatpush.msra.mxu3 %v425_v61  ;;  %534 = vmatpush.msrb.mxu1 %v440_v2 }
  0xe1   :  { %v211_v11 = vrot.slane %v210_v8, 2 }
  0xe2   :  { %496 = vmatpush.msra.mxu3 %v423_v4  ;;  %v456_v4 = vld [vmem:[#allocation13 + $0x148] sm:$0xff] }
  0xe3   :  { %v212_v14 = vadd.f32 %v211_v11, %v210_v8  ;;  %v438_v8 = vld [vmem:[#allocation13 + $0xb8] sm:$0xff] }
  0xe4   :  { %535 = vmatpush.msrb.mxu1 %v438_v8  ;;  %497 = vmatpush.msra.mxu3 %v421_v10  ;;  %v416_v8 = vld [vmem:[#allocation13 + $0x8] sm:$0xff] }
  0xe5   :  { %v213_v15 = vrot.slane %v212_v14, 1 }
  0xe7   :  { %v214_v16 = vadd.f32 %v213_v15, %v212_v14  ;;  %v436_v14 = vld [vmem:[#allocation13 + $0xa8] sm:$0xff]  ;;  %v474_v15 = vld [vmem:[#allocation13 + $0x1d8] sm:$0xff] }
  0xe8   :  { %536 = vmatpush.msrb.mxu1 %v436_v14  ;;  %556 = vmatpush.msrb.mxu2 %v474_v15  ;;  %v449_v14 = vld [vmem:[#allocation13 + $0x110] sm:$0xff] }
  0xe9   :  { %v215_v17 = vmul.f32 %v214_v16, %v945_v51  ;;  %v419_v16 = vld [vmem:[#allocation13 + $0x20] sm:$0xff] }
  0xea   :  { %498 = vmatpush.msra.mxu3 %v419_v16 }
  0xeb   :  { %v221_v18 = vadd.f32 1e-05, %v215_v17 }
  0xed   :  { %637 = vrsqrt.f32 %v221_v18  ;;  %vm228_vm2 = vweird.f32 %v221_v18 }
  0xf3   :  { %v638_v19 = vpop.eup %637 }
  0xf4   :  { %v223_v20 = vmul.f32 %v638_v19, %v221_v18  ;;  %vm229_vm1 = vweird.f32 %v638_v19 }
  0xf5   :  { %vm230_vm3 = vmor %vm228_vm2, %vm229_vm1 }
  0xf6   :  { %v224_v21 = vmul.f32 %v638_v19, %v223_v20  ;;  %v434_v20 = vld [vmem:[#allocation13 + $0x98] sm:$0xff] }
  0xf7   :  { %537 = vmatpush.msrb.mxu1 %v434_v20 }
  0xf8   :  { %v225_v22 = vmul.f32 0.5, %v224_v21  ;;  %v472_v21 = vld [vmem:[#allocation13 + $0x1c8] sm:$0xff] }
  0xf9   :  { %557 = vmatpush.msrb.mxu2 %v472_v21  ;;  %v448_v21 = vld [vmem:[#allocation13 + $0x108] sm:$0xff] }
  0xfa   :  { %v226_v24 = vsub.f32 1.5, %v225_v22  ;;  %v417_v22 = vld [vmem:[#allocation13 + $0x10] sm:$0xff] }
  0xfb   :  { %499 = vmatpush.msra.mxu3 %v417_v22 }
  0xfc   :  { %v227_v25 = vmul.f32 %v638_v19, %v226_v24 }
  0xfe   :  { %v231_v28 = vsel %vm230_vm3, %v638_v19, %v227_v25  ;;  %v471_v19 = vld [vmem:[#allocation13 + $0x1c0] sm:$0xff]  ;;  %v469_v25 = vld [vmem:[#allocation13 + $0x1b0] sm:$0xff] }
  0xff   :  { %v232_v29 = vmul.f32 %v231_v28, %v219_v26  ;;  %v233_v33 = vmul.f32 %v231_v28, %v220_v30  ;;  %511 = vmatpush.msrb.mxu0 %v471_v19  ;;  %v432_v26 = vld [vmem:[#allocation13 + $0x88] sm:$0xff]  ;;  %v415_v28 = vld [vmem:[#allocation13] sm:$0xff]  ;;  %v430_v30 = vld [vmem:[#allocation13 + $0x78] sm:$0xff] }
 0x100   :  { %538 = vmatpush.msrb.mxu1 %v432_v26  ;;  %500 = vmatpush.msra.mxu3 %v415_v28 }
 0x101   :  { %v237_v31 = vadd.f32 %v634_v27, %v232_v29  ;;  %v238_v34 = vadd.f32 %v634_v27, %v233_v33  ;;  %v470_v27 = vld [vmem:[#allocation13 + $0x1b8] sm:$0xff]  ;;  %512 = vmatpush.msrb.mxu0 %v469_v25  ;;  %v467_v29 = vld [vmem:[#allocation13 + $0x1a0] sm:$0xff]  ;;  %v468_v33 = vld [vmem:[#allocation13 + $0x1a8] sm:$0xff] }
 0x102   :  { %558 = vmatpush.msrb.mxu2 %v470_v27  ;;  %603 = vmatpush.msrb.mxu3 %v477_v1 }
 0x103   :  { %v239_v32 = vmax.f32 %v237_v31, 0.0  ;;  %v240_v35 = vmax.f32 %v238_v34, 0.0  ;;  %v465_v34 = vld [vmem:[#allocation13 + $0x190] sm:$0xff]  ;;  %513 = vmatpush.msrb.mxu0 %v467_v29  ;;  %539 = vmatpush.msrb.mxu1 %v430_v30 }
 0x104   :  { %559 = vmatpush.msrb.mxu2 %v468_v33  ;;  %604 = vmatpush.msrb.mxu3 %v475_v7 }
 0x105   :  { %295 = vmatmul.f32.vlgmr.msra.gmra.mxu1 %v239_v32  ;;  %318 = vmatmul.f32.vlgmr.msra.gmra.mxu2 %v239_v32 }
 0x106   :  { %514 = vmatpush.msrb.mxu0 %v465_v34  ;;  %605 = vmatpush.msrb.mxu3 %v473_v13  ;;  %v452_v13 = vld [vmem:[#allocation13 + $0x128] sm:$0xff] }
 0x108   :  { %515 = vmatpush.msrb.mxu0 %v463_v40  ;;  %606 = vmatpush.msrb.mxu3 %v471_v19 }
 0x10a   :  { %516 = vmatpush.msrb.mxu0 %v461_v46  ;;  %607 = vmatpush.msrb.mxu3 %v469_v25 }
 0x10c   :  { %517 = vmatpush.msrb.mxu0 %v459_v52  ;;  %608 = vmatpush.msrb.mxu3 %v467_v29  ;;  %v325_v29 = vld [vmem:[%s1014_s7] sm:$0x3] }
 0x10d   :  { %298 = vmatmul.f32.gmra.mxu1 %v240_v35  ;;  %321 = vmatmul.f32.gmra.mxu2 %v240_v35  ;;  %v428_v35 = vld [vmem:[#allocation13 + $0x68] sm:$0xff]  ;;  %v368_v33 = vperm.slane %v325_v29, 0 }
 0x10e   :  { %540 = vmatpush.msrb.mxu1 %v428_v35  ;;  %609 = vmatpush.msrb.mxu3 %v465_v34 }
 0x110   :  { %541 = vmatpush.msrb.mxu1 %v426_v41  ;;  %610 = vmatpush.msrb.mxu3 %v463_v40 }
 0x112   :  { %611 = vmatpush.msrb.mxu3 %v461_v46 }
 0x114   :  { %612 = vmatpush.msrb.mxu3 %v459_v52 }
 0x182   :  { %v296_v39 = vpop.f32.mrf.mxu1 }
 0x183   :  { %v952_v49 = vadd.f32 %v296_v39, %v275_v44  ;;  %v466_v39 = vld [vmem:[#allocation13 + $0x198] sm:$0xff] }
 0x184   :  { %560 = vmatpush.msrb.mxu2 %v466_v39 }
 0x188   :  { %v319_v45 = vpop.f32.mrf.mxu2 }
 0x189   :  { %v958_v62 = vadd.f32 %v319_v45, %v276_v54  ;;  %v464_v45 = vld [vmem:[#allocation13 + $0x188] sm:$0xff] }
 0x18a   :  { %v299_v47 = vpop.f32.mrf.mxu1  ;;  %561 = vmatpush.msrb.mxu2 %v464_v45 }
 0x18b   :  { %v954_v50 = vadd.f32 %v299_v47, %v275_v44  ;;  %v424_v47 = vld [vmem:[#allocation13 + $0x48] sm:$0xff] }
 0x18c   :  { %542 = vmatpush.msrb.mxu1 %v424_v47 }
 0x18d   :  { %v327_v55 = vadd.f32 %v954_v50, %v952_v49 }
 0x18e   :  { %543 = vmatpush.msrb.mxu1 %v422_v56 }
 0x18f   :  { %v328_v58 = vrot.slane %v327_v55, 4 }
 0x190   :  { %v322_v60 = vpop.f32.mrf.mxu2 }
 0x191   :  { %v329_v63 = vadd.f32 %v328_v58, %v327_v55  ;;  %v960_v0 = vadd.f32 %v322_v60, %v276_v54  ;;  %v457_v58 = vld [vmem:[#allocation13 + $0x150] sm:$0xff] }
 0x192   :  { %518 = vmatpush.msrb.mxu0 %v457_v58  ;;  %613 = vmatpush.msrb.mxu3 %v457_v58 }
 0x193   :  { %v330_v5 = vrot.slane %v329_v63, 2  ;;  %v334_v6 = vadd.f32 %v960_v0, %v958_v62 }
 0x195   :  { %v331_v11 = vadd.f32 %v330_v5, %v329_v63  ;;  %v335_v12 = vrot.slane %v334_v6, 4  ;;  %v458_v63 = vld [vmem:[#allocation13 + $0x158] sm:$0xff]  ;;  %v453_v5 = vld [vmem:[#allocation13 + $0x130] sm:$0xff] }
 0x197   :  { %v332_v17 = vrot.slane %v331_v11, 1  ;;  %v336_v18 = vadd.f32 %v335_v12, %v334_v6  ;;  %v451_v12 = vld [vmem:[#allocation13 + $0x120] sm:$0xff] }
 0x199   :  { %v333_v23 = vadd.f32 %v332_v17, %v331_v11  ;;  %v337_v24 = vrot.slane %v336_v18, 2  ;;  %v450_v17 = vld [vmem:[#allocation13 + $0x118] sm:$0xff] }
 0x19b   :  { %v341_v31 = vmul.f32 %v333_v23, %v945_v51  ;;  %v338_v32 = vadd.f32 %v337_v24, %v336_v18  ;;  %v447_v18 = vld [vmem:[#allocation13 + $0x100] sm:$0xff] }
 0x19d   :  { %v966_v36 = vsub.f32 %v952_v49, %v341_v31  ;;  %v969_v37 = vsub.f32 %v954_v50, %v341_v31  ;;  %v339_v38 = vrot.slane %v338_v32, 1  ;;  %v462_v50 = vld [vmem:[#allocation13 + $0x178] sm:$0xff] }
 0x19e   :  { %562 = vmatpush.msrb.mxu2 %v462_v50 }
 0x19f   :  { %v347_v42 = vmul.f32 %v966_v36, %v966_v36  ;;  %v349_v43 = vmul.f32 %v969_v37, %v969_v37  ;;  %v340_v44 = vadd.f32 %v339_v38, %v338_v32  ;;  %v372_v40 = vmul.f32 %v368_v33, %v966_v36 }
 0x1a0   :  { %563 = vmatpush.msrb.mxu2 %v460_v57  ;;  %v374_v47 = vmul.f32 %v368_v33, %v969_v37 }
 0x1a1   :  { %v351_v48 = vadd.f32 %v349_v43, %v347_v42  ;;  %v342_v49 = vmul.f32 %v340_v44, %v945_v51  ;;  %v369_v44 = vperm.slane %v325_v29, 1 }
 0x1a2   :  { %564 = vmatpush.msrb.mxu2 %v458_v63 }
 0x1a3   :  { %v352_v53 = vrot.slane %v351_v48, 4  ;;  %v977_v54 = vsub.f32 %v958_v62, %v342_v49  ;;  %v980_v55 = vsub.f32 %v960_v0, %v342_v49  ;;  %v420_v62 = vld [vmem:[#allocation13 + $0x28] sm:$0xff]  ;;  %v455_v0 = vld [vmem:[#allocation13 + $0x140] sm:$0xff] }
 0x1a4   :  { %544 = vmatpush.msrb.mxu1 %v420_v62  ;;  %519 = vmatpush.msrb.mxu0 %v455_v0 }
 0x1a5   :  { %v353_v59 = vadd.f32 %v352_v53, %v351_v48  ;;  %v348_v60 = vmul.f32 %v977_v54, %v977_v54  ;;  %v350_v61 = vmul.f32 %v980_v55, %v980_v55  ;;  %565 = vmatpush.msrb.mxu2 %v456_v4  ;;  %614 = vmatpush.msrb.mxu3 %v455_v0 }
 0x1a6   :  { %545 = vmatpush.msrb.mxu1 %v418_v3  ;;  %520 = vmatpush.msrb.mxu0 %v453_v5  ;;  %v373_v53 = vmul.f32 %v369_v44, %v977_v54  ;;  %v375_v58 = vmul.f32 %v369_v44, %v980_v55  ;;  %v479_v54 = vld [vmem:[%s1017_s10] sm:$0x3] }
 0x1a7   :  { %v354_v1 = vrot.slane %v353_v59, 2  ;;  %v358_v2 = vadd.f32 %v350_v61, %v348_v60  ;;  %566 = vmatpush.msrb.mxu2 %v454_v9  ;;  %615 = vmatpush.msrb.mxu3 %v453_v5  ;;  %v482_v3 = vperm.slane %v479_v54, 1 }
 0x1a8   :  { %546 = vmatpush.msrb.mxu1 %v416_v8  ;;  %521 = vmatpush.msrb.mxu0 %v451_v12 }
 0x1a9   :  { %v355_v6 = vadd.f32 %v354_v1, %v353_v59  ;;  %v359_v7 = vrot.slane %v358_v2, 4  ;;  %567 = vmatpush.msrb.mxu2 %v452_v13  ;;  %616 = vmatpush.msrb.mxu3 %v451_v12  ;;  %v481_v1 = vperm.slane %v479_v54, 0 }
 0x1aa   :  { %522 = vmatpush.msrb.mxu0 %v449_v14 }
 0x1ab   :  { %v356_v10 = vrot.slane %v355_v6, 1  ;;  %v360_v11 = vadd.f32 %v359_v7, %v358_v2  ;;  %568 = vmatpush.msrb.mxu2 %v450_v17  ;;  %617 = vmatpush.msrb.mxu3 %v449_v14 }
 0x1ac   :  { %523 = vmatpush.msrb.mxu0 %v447_v18 }
 0x1ad   :  { %v357_v15 = vadd.f32 %v356_v10, %v355_v6  ;;  %v361_v16 = vrot.slane %v360_v11, 2  ;;  %569 = vmatpush.msrb.mxu2 %v448_v21  ;;  %618 = vmatpush.msrb.mxu3 %v447_v18 }
 0x1af   :  { %v362_v19 = vadd.f32 %v361_v16, %v360_v11  ;;  %v365_v20 = vmul.f32 %v357_v15, %v945_v51 }
 0x1b1   :  { %v363_v22 = vrot.slane %v362_v19, 1  ;;  %v376_v23 = vadd.f32 1e-05, %v365_v20 }
 0x1b3   :  { %v364_v24 = vadd.f32 %v363_v22, %v362_v19  ;;  %639 = vrsqrt.f32 %v376_v23  ;;  %vm384_vm5 = vweird.f32 %v376_v23 }
 0x1b5   :  { %v366_v25 = vmul.f32 %v364_v24, %v945_v51  ;;  %v326_v51 = vld [vmem:[%s1015_s8] sm:$0x3] }
 0x1b6   :  { %v403_v41 = vperm.slane %v326_v51, 0  ;;  %v404_v50 = vperm.slane %v326_v51, 1 }
 0x1b7   :  { %v377_v26 = vadd.f32 1e-05, %v366_v25 }
 0x1b9   :  { %v640_v27 = vpop.eup %639  ;;  %641 = vrsqrt.f32 %v377_v26  ;;  %vm394_vm8 = vweird.f32 %v377_v26 }
 0x1ba   :  { %v379_v28 = vmul.f32 %v640_v27, %v376_v23  ;;  %vm385_vm4 = vweird.f32 %v640_v27 }
 0x1bb   :  { %vm386_vm6 = vmor %vm384_vm5, %vm385_vm4 }
 0x1bc   :  { %v380_v30 = vmul.f32 %v640_v27, %v379_v28 }
 0x1be   :  { %v381_v31 = vmul.f32 0.5, %v380_v30 }
 0x1bf   :  { %v642_v32 = vpop.eup %641 }
 0x1c0   :  { %v382_v34 = vsub.f32 1.5, %v381_v31  ;;  %v389_v35 = vmul.f32 %v642_v32, %v377_v26  ;;  %vm395_vm7 = vweird.f32 %v642_v32 }
 0x1c1   :  { %vm396_vm9 = vmor %vm394_vm8, %vm395_vm7 }
 0x1c2   :  { %v383_v38 = vmul.f32 %v640_v27, %v382_v34  ;;  %v390_v39 = vmul.f32 %v642_v32, %v389_v35 }
 0x1c4   :  { %v387_v42 = vsel %vm386_vm6, %v640_v27, %v383_v38  ;;  %v391_v43 = vmul.f32 0.5, %v390_v39 }
 0x1c5   :  { %v398_v45 = vmul.f32 %v387_v42, %v372_v40  ;;  %v400_v56 = vmul.f32 %v387_v42, %v374_v47 }
 0x1c6   :  { %v392_v46 = vsub.f32 1.5, %v391_v43 }
 0x1c7   :  { %v407_v48 = vadd.f32 %v403_v41, %v398_v45  ;;  %v409_v60 = vadd.f32 %v403_v41, %v400_v56 }
 0x1c8   :  { %v393_v49 = vmul.f32 %v642_v32, %v392_v46 }
 0x1c9   :  { %v411_v52 = vmax.f32 %v407_v48, 0.0  ;;  %v413_v37 = vmax.f32 %v409_v60, 0.0 }
 0x1ca   :  { %v397_v36 = vsel %vm396_vm9, %v642_v32, %v393_v49 }
 0x1cb   :  { %501 = vmatmul.f32.vlgmr.msra.gmra.mxu3 %v411_v52  ;;  %547 = vmatmul.f32.vlgmr.msrb.gmra.mxu1 %v411_v52  ;;  %v399_v57 = vmul.f32 %v397_v36, %v373_v53  ;;  %v401_v62 = vmul.f32 %v397_v36, %v375_v58 }
 0x1cd   :  { %v408_v59 = vadd.f32 %v404_v50, %v399_v57  ;;  %v410_v63 = vadd.f32 %v404_v50, %v401_v62 }
 0x1cf   :  { %v412_v61 = vmax.f32 %v408_v59, 0.0  ;;  %v414_v0 = vmax.f32 %v410_v63, 0.0 }
 0x1d1   :  { %524 = vmatmul.f32.vlgmr.msrb.gmra.mxu0 %v412_v61  ;;  %570 = vmatmul.f32.vlgmr.msrb.gmra.mxu2 %v412_v61 }
 0x1d3   :  { %504 = vmatmul.f32.gmra.mxu3 %v413_v37  ;;  %550 = vmatmul.f32.gmra.mxu1 %v413_v37 }
 0x1d9   :  { %573 = vmatmul.f32.gmra.mxu2 %v414_v0 }
 0x1db   :  { %527 = vmatmul.f32.vlgmr.msrb.gmra.mxu3 %v414_v0 }
 0x248   :  { %v548_v2 = vpop.f32.mrf.mxu1 }
 0x249   :  { %v549_v7 = vadd.f32 %v548_v2, %v482_v3 }
 0x24e   :  { %v502_v55 = vpop.f32.mrf.mxu3  ;;  %v525_v5 = vpop.f32.mrf.mxu0 }
 0x24f   :  { %v503_v4 = vadd.f32 %v502_v55, %v481_v1 }
 0x250   :  { %v551_v11 = vpop.f32.mrf.mxu1 }
 0x251   :  { %v526_v6 = vadd.f32 %v525_v5, %v503_v4  ;;  %v552_v12 = vadd.f32 %v551_v11, %v482_v3 }
 0x253   :  { %577 = vst [vmem:[#allocation14] sm:$0xff] %v526_v6 }
 0x254   :  { %v571_v8 = vpop.f32.mrf.mxu2 }
 0x255   :  { %v572_v9 = vadd.f32 %v571_v8, %v549_v7 }
 0x256   :  { %v505_v10 = vpop.f32.mrf.mxu3 }
 0x257   :  { %578 = vst [vmem:[#allocation14 + $0x8] sm:$0xff] %v572_v9  ;;  %v506_v14 = vadd.f32 %v505_v10, %v481_v1 }
 0x25c   :  { %v574_v13 = vpop.f32.mrf.mxu2 }
 0x25d   :  { %v575_v15 = vadd.f32 %v574_v13, %v552_v12 }
 0x25e   :  { %v528_v16 = vpop.f32.mrf.mxu3 }
 0x25f   :  { %580 = vst [vmem:[#allocation14 + $0x18] sm:$0xff] %v575_v15  ;;  %v529_v17 = vadd.f32 %v528_v16, %v506_v14 }
 0x261   :  { %579 = vst [vmem:[#allocation14 + $0x10] sm:$0xff] %v529_v17 }
 0x262   :  { %593 = dma.vmem_to_hbm [thread:$0]  %s586_s3, 512, %s588_s19, [#allocation4], %s850_s16, %s850_s16, %s851_s17  }
 0x263   :  { %843 = dma.done.wait [#allocation4], 512  }
 0x264   :  { %844 = vsyncadd [#allocation4], 4294966784 }
 0x265   :  { %598 = vsyncpa [#allocation3], 1 }
 0x266   :  { %599 = vsyncpa [#allocation6], 1 }
 0x267   :  { %600 = vsyncpa [#allocation9], 1 }
 0x268   :  { %601 = vsyncpa [#allocation12], 1 }
 0x269   :  { %602 = vsyncpa [#allocation4], 1 }

</bundles_post_ra>
